<compile_context>
chip_gen: v7x
topology: tpu7x:2x2x1
jax: 0.10.0
libtpu: 0.0.40
codegen_flags: <defaults>
</compile_context>

<pallas_src>
import functools

import jax
import jax.numpy as jnp
from jax.experimental import pallas as pl
from jax.experimental.pallas import tpu as pltpu

_LANES = 128
_DEFAULT_MAX_TILE_ROWS = 512   # (512, 128) f32 = 256 KiB per block


def _activate(x, use_sigmoid: bool):
    return jax.nn.sigmoid(x) if use_sigmoid else x


def _infer_kernel(logits_ref, out_ref, *, use_sigmoid: bool):
    out_ref[...] = _activate(logits_ref[...], use_sigmoid)


def _train_kernel(logits_ref, labels_ref, mask_ref, out_ref, loss_ref, acc_ref,
                  *, use_sigmoid: bool, loss_mode: str, inv_n: float):
    step = pl.program_id(0)

    @pl.when(step == 0)
    def _():
        acc_ref[...] = jnp.zeros_like(acc_ref)

    out = _activate(logits_ref[...], use_sigmoid)
    out_ref[...] = out

    diff = out - labels_ref[...]
    if loss_mode == "mse":
        err = diff * diff
    elif loss_mode == "l1":
        err = jnp.abs(diff)
    else:
        raise ValueError(f"unknown loss_mode {loss_mode}")

    # Padded lanes carry mask == 0 (zero-padded by the wrapper), so no extra
    # in-kernel padding mask is needed.
    acc_ref[...] += jnp.sum(err * mask_ref[...], axis=(0, 1), keepdims=True)

    @pl.when(step == pl.num_programs(0) - 1)
    def _():
        # torch.mean divides by B; inv_n = 1/B is a trace-time constant.
        # TODO(synk): emit this scalar via an SMEM output once validated on all
        # target chips; (1, 1) VMEM writeback is kept here for robustness.
        loss_ref[...] = acc_ref[...] * jnp.float32(inv_n)


def _tile_geometry(batch: int, max_tile_rows: int):
    rows = max(1, -(-batch // _LANES))        # ceil(B / 128)
    rows = ((rows + 7) // 8) * 8              # sublane multiple of 8
    tile_rows = min(max_tile_rows, rows)
    padded_rows = -(-rows // tile_rows) * tile_rows
    return tile_rows, padded_rows


def _pad_to_tiles(v, padded_rows: int):
    v = jnp.asarray(v, jnp.float32).reshape(-1)
    total = padded_rows * _LANES
    return jnp.pad(v, (0, total - v.shape[0])).reshape(padded_rows, _LANES)


def regression_head_forward(logits, targets=None, *, loss_mode: str = "mse",
                            use_sigmoid: bool = False,
                            max_tile_rows: int = _DEFAULT_MAX_TILE_ROWS):
    """JAX/Pallas equivalent of RegressionHead.forward.

    Args:
        logits: (B,) or (B, 1) array.
        targets: optional dict with 'value' (B,) and 'valid' (B,) arrays
            (the torch list-of-dicts stacking is assumed done by the caller).
        max_tile_rows: rows per grid block (multiple of 8); 512 saturates HBM
            on v5e/v6e/v7x while staying tiny in VMEM.

    Returns:
        (outputs, losses) where outputs is (B,) and losses is {} or
        {'regress': scalar}.
    """
    assert logits.ndim in (1, 2)
    if logits.ndim == 2:
        assert logits.shape[1] == 1
        logits = logits[:, 0]
    assert max_tile_rows % 8 == 0

    batch = logits.shape[0]
    tile_rows, padded_rows = _tile_geometry(batch, max_tile_rows)
    grid = (padded_rows // tile_rows,)
    blk = pl.BlockSpec((tile_rows, _LANES), lambda i: (i, 0))

    logits_p = _pad_to_tiles(logits, padded_rows)

    if targets is None:
        # Inference path: logits in, outputs out. No label/mask DMA, no loss.
        out_p = pl.pallas_call(
            functools.partial(_infer_kernel, use_sigmoid=use_sigmoid),
            out_shape=jax.ShapeDtypeStruct((padded_rows, _LANES), jnp.float32),
            grid=grid,
            in_specs=[blk],
            out_specs=blk,
            compiler_params=pltpu.CompilerParams(
                dimension_semantics=("parallel",)),
        )(logits_p)
        return out_p.reshape(-1)[:batch], {}

    labels_p = _pad_to_tiles(targets["value"], padded_rows)
    mask_p = _pad_to_tiles(targets["valid"], padded_rows)

    kernel = functools.partial(
        _train_kernel, use_sigmoid=use_sigmoid, loss_mode=loss_mode,
        inv_n=1.0 / batch)

    out_p, loss = pl.pallas_call(
        kernel,
        out_shape=(
            jax.ShapeDtypeStruct((padded_rows, _LANES), jnp.float32),
            jax.ShapeDtypeStruct((1, 1), jnp.float32),
        ),
        grid=grid,
        in_specs=[blk, blk, blk],
        out_specs=(blk, pl.BlockSpec((1, 1), lambda i: (0, 0))),
        scratch_shapes=[pltpu.VMEM((1, 1), jnp.float32)],
        compiler_params=pltpu.CompilerParams(
            dimension_semantics=("arbitrary",)),
    )(logits_p, labels_p, mask_p)

    outputs = out_p.reshape(-1)[:batch]
    return outputs, {"regress": loss[0, 0]}


if __name__ == "__main__":
    key = jax.random.PRNGKey(0)
    k1, k2, k3 = jax.random.split(key, 3)

    # --- small batch, matching the module's typical usage ---
    B = 8
    logits = jax.random.normal(k1, (B, 1), dtype=jnp.float32)      # (BatchSize, 1)
    labels = jax.random.uniform(k2, (B,), dtype=jnp.float32)       # targets in [0, 1]
    valid = (jax.random.uniform(k3, (B,)) > 0.3).astype(jnp.float32)
    targets = {"value": labels, "valid": valid}

    # mse + sigmoid
    outputs, losses = regression_head_forward(
        logits, targets, loss_mode="mse", use_sigmoid=True)
    outputs = jax.block_until_ready(outputs)
    loss = jax.block_until_ready(losses["regress"])
    ref_out = jax.nn.sigmoid(logits[:, 0])
    ref_loss = jnp.mean(jnp.square(ref_out - labels) * valid)
    assert jnp.allclose(outputs, ref_out, atol=1e-5)
    assert jnp.allclose(loss, ref_loss, atol=1e-5)

    # l1, no sigmoid
    outputs2, losses2 = regression_head_forward(
        logits, targets, loss_mode="l1", use_sigmoid=False)
    jax.block_until_ready(losses2["regress"])
    ref_loss2 = jnp.mean(jnp.abs(logits[:, 0] - labels) * valid)
    assert jnp.allclose(losses2["regress"], ref_loss2, atol=1e-5)

    # inference path (no targets): dedicated kernel, no loss traffic
    outputs3, losses3 = regression_head_forward(logits, None, use_sigmoid=True)
    jax.block_until_ready(outputs3)
    assert losses3 == {}
    assert jnp.allclose(outputs3, ref_out, atol=1e-5)

    # multi-step grid path (small tile override) to exercise the loss accumulator
    kb1, kb2, kb3 = jax.random.split(jax.random.PRNGKey(1), 3)
    Bb = 2000
    lg = jax.random.normal(kb1, (Bb,), dtype=jnp.float32)
    lb = jax.random.uniform(kb2, (Bb,), dtype=jnp.float32)
    vd = (jax.random.uniform(kb3, (Bb,)) > 0.5).astype(jnp.float32)
    out_b, loss_b = regression_head_forward(
        lg, {"value": lb, "valid": vd}, loss_mode="mse", use_sigmoid=True,
        max_tile_rows=8)
    jax.block_until_ready(loss_b["regress"])
    ref_b = jnp.mean(jnp.square(jax.nn.sigmoid(lg) - lb) * vd)
    assert jnp.allclose(out_b, jax.nn.sigmoid(lg), atol=1e-5)
    assert jnp.allclose(loss_b["regress"], ref_b, atol=1e-5)

    print("KERNEL_OK")
</pallas_src>

<mosaic_0001>
module attributes {stable_mosaic.version = 11 : i64} {
  func.func @_train_kernel(%arg0: i32, %arg1: memref<8x128xf32, #tpu.memory_space<vmem>>, %arg2: memref<8x128xf32, #tpu.memory_space<vmem>>, %arg3: memref<8x128xf32, #tpu.memory_space<vmem>>, %arg4: memref<8x128xf32, #tpu.memory_space<vmem>>, %arg5: memref<1x1xf32, #tpu.memory_space<vmem>>, %arg6: memref<1x1xf32, #tpu.memory_space<vmem>>) attributes {dimension_semantics = [#tpu.dimension_semantics<arbitrary>], iteration_bounds = array<i64: 1>, scalar_prefetch = 0 : i64, scratch_operands = 1 : i64, tpu.core_type = #tpu.core_type<tc>, window_params = [{transform_indices = @transform_0, window_bounds = array<i64: 8, 128>}, {transform_indices = @transform_1, window_bounds = array<i64: 8, 128>}, {transform_indices = @transform_2, window_bounds = array<i64: 8, 128>}, {transform_indices = @transform_3, window_bounds = array<i64: 8, 128>}, {pipeline_mode = #tpu.pipeline_mode<synchronous>, transform_indices = @transform_4, window_bounds = array<i64: 1, 1>}]} {
    %c0_i32 = arith.constant 0 : i32
    %0 = arith.cmpi eq, %arg0, %c0_i32 : i32
    %1 = arith.extui %0 : i1 to i32
    %c0_i32_0 = arith.constant 0 : i32
    %2 = arith.cmpi ne, %1, %c0_i32_0 : i32
    scf.if %2 {
      %cst_15 = arith.constant 0.000000e+00 : f32
      %26 = vector.broadcast %cst_15 : f32 to vector<1x1xf32>
      %c0_16 = arith.constant 0 : index
      %c0_17 = arith.constant 0 : index
      %27 = vector.load %arg6[%c0_16, %c0_17] : memref<1x1xf32, #tpu.memory_space<vmem>>, vector<1x1xf32>
      tpu.vector_store %arg6[%c0_16, %c0_17], %26 {strides = array<i32>} : memref<1x1xf32, #tpu.memory_space<vmem>>, vector<1x1xf32>,
    } else {
    }
    %c0 = arith.constant 0 : index
    %c0_1 = arith.constant 0 : index
    %3 = vector.load %arg1[%c0, %c0_1] : memref<8x128xf32, #tpu.memory_space<vmem>>, vector<8x128xf32>
    %4 = arith.negf %3 : vector<8x128xf32>
    %5 = math.exp %4 : vector<8x128xf32>
    %cst = arith.constant 1.000000e+00 : f32
    %6 = vector.broadcast %cst : f32 to vector<8x128xf32>
    %7 = arith.addf %6, %5 : vector<8x128xf32>
    %8 = arith.divf %6, %7 : vector<8x128xf32>
    %c0_2 = arith.constant 0 : index
    %c0_3 = arith.constant 0 : index
    %9 = vector.load %arg4[%c0_2, %c0_3] : memref<8x128xf32, #tpu.memory_space<vmem>>, vector<8x128xf32>
    tpu.vector_store %arg4[%c0_2, %c0_3], %8 {strides = array<i32>} : memref<8x128xf32, #tpu.memory_space<vmem>>, vector<8x128xf32>,
    %c0_4 = arith.constant 0 : index
    %c0_5 = arith.constant 0 : index
    %10 = vector.load %arg2[%c0_4, %c0_5] : memref<8x128xf32, #tpu.memory_space<vmem>>, vector<8x128xf32>
    %11 = arith.subf %8, %10 : vector<8x128xf32>
    %12 = arith.mulf %11, %11 : vector<8x128xf32>
    %c0_6 = arith.constant 0 : index
    %c0_7 = arith.constant 0 : index
    %13 = vector.load %arg6[%c0_6, %c0_7] : memref<1x1xf32, #tpu.memory_space<vmem>>, vector<1x1xf32>
    %c0_8 = arith.constant 0 : index
    %c0_9 = arith.constant 0 : index
    %14 = vector.load %arg3[%c0_8, %c0_9] : memref<8x128xf32, #tpu.memory_space<vmem>>, vector<8x128xf32>
    %15 = arith.mulf %12, %14 : vector<8x128xf32>
    %16 = vector.shape_cast %15 : vector<8x128xf32> to vector<1x8x128xf32>
    %cst_10 = arith.constant dense<0.000000e+00> : vector<1xf32>
    %17 = vector.multi_reduction <add>, %16, %cst_10 [1, 2] : vector<1x8x128xf32> to vector<1xf32>
    %18 = vector.shape_cast %17 : vector<1xf32> to vector<1x1x1xf32>
    %19 = vector.extract %18[0, 0, 0] : f32 from vector<1x1x1xf32>
    %20 = vector.broadcast %19 : f32 to vector<1x1xf32>
    %21 = arith.addf %13, %20 : vector<1x1xf32>
    %c0_11 = arith.constant 0 : index
    %c0_12 = arith.constant 0 : index
    %22 = vector.load %arg6[%c0_11, %c0_12] : memref<1x1xf32, #tpu.memory_space<vmem>>, vector<1x1xf32>
    tpu.vector_store %arg6[%c0_11, %c0_12], %21 {strides = array<i32>} : memref<1x1xf32, #tpu.memory_space<vmem>>, vector<1x1xf32>,
    %c0_i32_13 = arith.constant 0 : i32
    %23 = arith.cmpi eq, %arg0, %c0_i32_13 : i32
    %24 = arith.extui %23 : i1 to i32
    %c0_i32_14 = arith.constant 0 : i32
    %25 = arith.cmpi ne, %24, %c0_i32_14 : i32
    scf.if %25 {
      %c0_15 = arith.constant 0 : index
      %c0_16 = arith.constant 0 : index
      %26 = vector.load %arg6[%c0_15, %c0_16] : memref<1x1xf32, #tpu.memory_space<vmem>>, vector<1x1xf32>
      %cst_17 = arith.constant 1.250000e-01 : f32
      %27 = vector.broadcast %cst_17 : f32 to vector<1x1xf32>
      %28 = arith.mulf %26, %27 : vector<1x1xf32>
      %c0_18 = arith.constant 0 : index
      %c0_19 = arith.constant 0 : index
      %29 = vector.load %arg5[%c0_18, %c0_19] : memref<1x1xf32, #tpu.memory_space<vmem>>, vector<1x1xf32>
      tpu.vector_store %arg5[%c0_18, %c0_19], %28 {strides = array<i32>} : memref<1x1xf32, #tpu.memory_space<vmem>>, vector<1x1xf32>,
    } else {
    }
    return
  }
  func.func @transform_0(%arg0: i32) -> (i32, i32) {
    %c0_i32 = arith.constant 0 : i32
    %c0_i32_0 = arith.constant 0 : i32
    return %arg0, %c0_i32 : i32, i32
  }
  func.func @transform_1(%arg0: i32) -> (i32, i32) {
    %c0_i32 = arith.constant 0 : i32
    %c0_i32_0 = arith.constant 0 : i32
    return %arg0, %c0_i32 : i32, i32
  }
  func.func @transform_2(%arg0: i32) -> (i32, i32) {
    %c0_i32 = arith.constant 0 : i32
    %c0_i32_0 = arith.constant 0 : i32
    return %arg0, %c0_i32 : i32, i32
  }
  func.func @transform_3(%arg0: i32) -> (i32, i32) {
    %c0_i32 = arith.constant 0 : i32
    %c0_i32_0 = arith.constant 0 : i32
    return %arg0, %c0_i32 : i32, i32
  }
  func.func @transform_4(%arg0: i32) -> (i32, i32) {
    %c0_i32 = arith.constant 0 : i32
    %c0_i32_0 = arith.constant 0 : i32
    %c0_i32_1 = arith.constant 0 : i32
    return %c0_i32, %c0_i32_0 : i32, i32
  }
}

</mosaic_0001>

<bundles_post_ra>
// kernel: tpu_custom_call.1
= control target key start
LH: loop header
LB: loop body
LE: loop exit
PB: predicated region body
PF: predicated region fallthrough
CT: control target
= control target key end

     0   :  { %10 = vsyncpa [#allocation4], 0  ;;  %s347_s0 = inlined_call_operand.hbm [shape: f32[8,128], index: 0, kind: input, shape index: {}]   ;;  %s348_s1 = inlined_call_operand.hbm [shape: f32[8,128], index: 1, kind: input, shape index: {}]   ;;  %s349_s2 = inlined_call_operand.hbm [shape: f32[8,128], index: 2, kind: input, shape index: {}]   ;;  %s350_s3 = inlined_call_operand.hbm [shape: f32[8,128], index: 3, kind: output, shape index: {0}]   ;;  %s351_s4 = inlined_call_operand.hbm [shape: f32[1,1], index: 4, kind: output, shape index: {1}]  }
   0x1   :  { %11 = vsyncpa [#allocation7], 0 }
   0x2   :  { %12 = vsyncpa [#allocation5], 0 }
   0x3   :  { %13 = vsyncpa [#allocation11], 0  ;;  %s253_s15 = smov [#allocation6]   ;;  %s254_s17 = smov [#allocation3]  }
   0x4   :  { %s30_s16 = sshll.u32 %s253_s15, 4  ;;  %s20_s18 = sshll.u32 %s254_s17, 4  ;;  %s31_s16 = int_to_ptr.vmem [resolvable:$true] %s30_s16  ;;  %s21_s18 = int_to_ptr.vmem [resolvable:$true] %s20_s18 }
   0x5   :  { %s135_s21 = scalar_lea.hbm %s348_s1, 128 }
   0x6   :  { %p136_p0 = scmp.ne.s32.totalorder %s348_s1, %s135_s21  ;;  %p139_p1 = scmp.lt.u32.totalorder %s135_s21, %s348_s1 }
   0x8   :  { %p141_p2 = pnand %p139_p1, %p136_p0 }
   0xa   :  { %144 = shalt.err (!%p141_p2)
}
   0xb   :  { %s145_s26 = scalar_lea.vmem %s31_s16, 128  ;;  %p150_p4 = scmp.lt.s32.totalorder %s31_s16, %s31_s16 }
   0xc   :  { %p146_p3 = scmp.ne.s32.totalorder %s31_s16, %s145_s26  ;;  %p151_p5 = scmp.lt.s32.totalorder %s145_s26, %s145_s26 }
   0xe   :  { %p152_p6 = por %p151_p5, %p150_p4 }
  0x10   :  { %p153_p7 = pnand %p152_p6, %p146_p3 }
  0x12   :  { %156 = shalt.err (!%p153_p7)
}
  0x13   :  { %33 = dma.hbm_to_vmem [thread:$0]  %s348_s1, 128, %s31_s16, [#allocation7]  }
  0x14   :  { %s157_s5 = scalar_lea.hbm %s347_s0, 128 }
  0x15   :  { %p158_p8 = scmp.ne.s32.totalorder %s347_s0, %s157_s5  ;;  %p161_p9 = scmp.lt.u32.totalorder %s157_s5, %s347_s0 }
  0x17   :  { %p163_p10 = pnand %p161_p9, %p158_p8 }
  0x19   :  { %166 = shalt.err (!%p163_p10)
}
  0x1a   :  { %s167_s10 = scalar_lea.vmem %s21_s18, 128  ;;  %p172_p12 = scmp.lt.s32.totalorder %s21_s18, %s21_s18 }
  0x1b   :  { %p168_p11 = scmp.ne.s32.totalorder %s21_s18, %s167_s10  ;;  %p173_p13 = scmp.lt.s32.totalorder %s167_s10, %s167_s10 }
  0x1d   :  { %p174_p0 = por %p173_p13, %p172_p12 }
  0x1f   :  { %p175_p1 = pnand %p174_p0, %p168_p11 }
  0x21   :  { %178 = shalt.err (!%p175_p1)
}
  0x22   :  { %23 = dma.hbm_to_vmem [thread:$0]  %s347_s0, 128, %s21_s18, [#allocation4]  }
  0x23   :  { %s255_s12 = smov [#allocation8]   ;;  %s179_s16 = scalar_lea.hbm %s349_s2, 128 }
  0x24   :  { %s40_s13 = sshll.u32 %s255_s12, 4  ;;  %p180_p2 = scmp.ne.s32.totalorder %s349_s2, %s179_s16  ;;  %s41_s13 = int_to_ptr.vmem [resolvable:$true] %s40_s13 }
  0x25   :  { %p183_p3 = scmp.lt.u32.totalorder %s179_s16, %s349_s2 }
  0x27   :  { %p185_p4 = pnand %p183_p3, %p180_p2 }
  0x29   :  { %188 = shalt.err (!%p185_p4)
}
  0x2a   :  { %s189_s22 = scalar_lea.vmem %s41_s13, 128  ;;  %p194_p6 = scmp.lt.s32.totalorder %s41_s13, %s41_s13 }
  0x2b   :  { %p190_p5 = scmp.ne.s32.totalorder %s41_s13, %s189_s22  ;;  %p195_p7 = scmp.lt.s32.totalorder %s189_s22, %s189_s22 }
  0x2d   :  { %p196_p8 = por %p195_p7, %p194_p6 }
  0x2f   :  { %p197_p9 = pnand %p196_p8, %p190_p5 }
  0x31   :  { %200 = shalt.err (!%p197_p9)
}
  0x32   :  { %43 = dma.hbm_to_vmem [thread:$0]  %s349_s2, 128, %s41_s13, [#allocation7]  }
  0x33   :  { %245 = dma.done.wait [#allocation4], 128  }
  0x34   :  { %246 = vsyncadd [#allocation4], 4294967168 }
  0x35   :  { %247 = dma.done.wait [#allocation7], 256  }
  0x36   :  { %248 = vsyncadd [#allocation7], 4294967040  ;;  %v59_v0 = vld [vmem:[#allocation3] sm:$0xff]  ;;  %v67_v4 = vld [vmem:[#allocation6] sm:$0xff]  ;;  %vm57_vm0 = vcmask 0   ;;  %v256_v10 = vmov 0.0  }
  0x37   :  { %v122_v1 = vmul.f32 -1.442695, %v59_v0  ;;  %v71_v7 = vld [vmem:[#allocation8] sm:$0xff]  ;;  %58 = vst.msk [vmem:[#allocation2] sm:$0x1] %vm57_vm0, %v256_v10  ;;  %s257_s2 = smov [#allocation9]  }
  0x38   :  { %s98_s23 = sshll.u32 %s257_s2, 4  ;;  %s99_s23 = int_to_ptr.vmem [resolvable:$true] %s98_s23 }
  0x39   :  { %131 = vpow2.f32 %v122_v1  ;;  %s201_s24 = scalar_lea.vmem %s99_s23, 128  ;;  %p206_p11 = scmp.lt.s32.totalorder %s99_s23, %s99_s23 }
  0x3a   :  { %p202_p10 = scmp.ne.s32.totalorder %s99_s23, %s201_s24  ;;  %p207_p12 = scmp.lt.s32.totalorder %s201_s24, %s201_s24 }
  0x3c   :  { %p208_p13 = por %p207_p12, %p206_p11 }
  0x3e   :  { %p209_p0 = pnand %p208_p13, %p202_p10 }
  0x43   :  { %v132_v2 = vpop.eup %131 }
  0x44   :  { %v63_v3 = vadd.f32 1.0, %v132_v2 }
  0x46   :  { %133 = vrcp.f32 %v63_v3 }
  0x50   :  { %v134_v5 = vpop.eup %133 }
  0x51   :  { %v68_v6 = vsub.f32 %v134_v5, %v67_v4  ;;  %66 = vst [vmem:[#allocation9] sm:$0xff] %v134_v5 }
  0x53   :  { %v69_v8 = vmul.f32 %v68_v6, %v68_v6 }
  0x55   :  { %v72_v9 = vmul.f32 %v71_v7, %v69_v8 }
  0x57   :  { %73 = vadd.xlane.f32.xlu0 %v72_v9 }
  0x58   :  { %212 = shalt.err (!%p209_p0)
}
  0x59   :  { %s213_s27 = scalar_lea.hbm %s350_s3, 128 }
  0x5a   :  { %p214_p1 = scmp.ne.s32.totalorder %s350_s3, %s213_s27  ;;  %p217_p2 = scmp.lt.u32.totalorder %s213_s27, %s350_s3 }
  0x5c   :  { %p219_p3 = pnand %p217_p2, %p214_p1 }
  0x5e   :  { %222 = shalt.err (!%p219_p3)
}
  0x5f   :  { %101 = dma.vmem_to_hbm [thread:$0]  %s99_s23, 128, %s350_s3, [#allocation5]   ;;  %v70_v18 = vld [vmem:[#allocation2] sm:$0x1] }
  0x60   :  { %s258_s9 = smov [#allocation10]  }
  0x61   :  { %s108_s10 = sshll.u32 %s258_s9, 4  ;;  %s109_s10 = int_to_ptr.vmem [resolvable:$true] %s108_s10 }
  0x62   :  { %s223_s3 = scalar_lea.vmem %s109_s10, 16  ;;  %s227_s1 = scalar_lea.vmem %s109_s10, 32 }
  0x63   :  { %p224_p4 = scmp.ne.s32.totalorder %s109_s10, %s223_s3  ;;  %p228_p5 = scmp.lt.s32.totalorder %s109_s10, %s109_s10 }
  0x64   :  { %p229_p6 = scmp.lt.s32.totalorder %s227_s1, %s223_s3 }
  0x66   :  { %p230_p7 = por %p229_p6, %p228_p5 }
  0x68   :  { %p231_p8 = pnand %p230_p7, %p224_p4 }
  0xe4   :  { %v74_v11 = vpop.xlane.xlu0 %73 }
  0xe5   :  { %v75_v12 = vrot.slane %v74_v11, 4 }
  0xe7   :  { %v76_v13 = vadd.f32 %v75_v12, %v74_v11 }
  0xe9   :  { %v77_v14 = vrot.slane %v76_v13, 2 }
  0xeb   :  { %v78_v15 = vadd.f32 %v77_v14, %v76_v13 }
  0xed   :  { %v79_v16 = vrot.slane %v78_v15, 1 }
  0xef   :  { %v80_v17 = vadd.f32 %v79_v16, %v78_v15 }
  0xf1   :  { %123 = vpush %v80_v17 }
 0x122   :  { %s124_s8 = spop %123 }
 0x123   :  { %v82_v19 = vstv %s124_s8 }
 0x124   :  { %v83_v20 = vadd.f32 %v82_v19, %v70_v18 }
 0x126   :  { %85 = vst.msk [vmem:[#allocation2] sm:$0x1] %vm57_vm0, %v83_v20 }
 0x12d   :  { %v89_v21 = vld [vmem:[#allocation2] sm:$0x1] }
 0x12e   :  { %v90_v22 = vmul.f32 0.125, %v89_v21 }
 0x130   :  { %91 = vst.msk [vmem:[#allocation10] sm:$0x1] %vm57_vm0, %v90_v22 }
 0x131   :  { %234 = shalt.err (!%p231_p8)
}
 0x132   :  { %s235_s13 = scalar_lea.hbm %s351_s4, 16 }
 0x133   :  { %p236_p9 = scmp.ne.s32.totalorder %s351_s4, %s235_s13  ;;  %p239_p10 = scmp.lt.u32.totalorder %s235_s13, %s351_s4 }
 0x135   :  { %p241_p11 = pnand %p239_p10, %p236_p9 }
 0x137   :  { %244 = shalt.err (!%p241_p11)
}
 0x138   :  { %111 = dma.vmem_to_hbm [thread:$0]  %s109_s10, 16, %s351_s4, [#allocation11]  }
 0x139   :  { %249 = dma.done.wait [#allocation5], 128  }
 0x13a   :  { %250 = vsyncadd [#allocation5], 4294967168 }
 0x13b   :  { %251 = dma.done.wait [#allocation11], 16  }
 0x13c   :  { %252 = vsyncadd [#allocation11], 4294967280 }
 0x13d   :  { %118 = vsyncpa [#allocation4], 1 }
 0x13e   :  { %119 = vsyncpa [#allocation7], 1 }
 0x13f   :  { %120 = vsyncpa [#allocation5], 1 }
 0x140   :  { %121 = vsyncpa [#allocation11], 1 }

</bundles_post_ra>
